<compile_context>
chip_gen: v6e
topology: v6e:2x2x1
jax: 0.10.0
libtpu: 0.0.40
codegen_flags: <defaults>
</compile_context>

<pallas_src>
import functools
import math

import jax
import jax.numpy as jnp
from jax import lax
from jax.experimental import pallas as pl
from jax.experimental.pallas import tpu as pltpu

LANE = 128
SUBLANE = 8


def _round_up(n, m):
    return (n + m - 1) // m * m


def _pick_tile(n, preferred):
    """Largest tile <= preferred that divides n and is a sublane multiple,
    falling back to the full dimension (always a legal block size)."""
    if n <= preferred:
        return n
    t = (preferred // SUBLANE) * SUBLANE
    while t >= SUBLANE:
        if n % t == 0:
            return t
        t -= SUBLANE
    return n


# --------------------------------------------------------------------------
# Kernel 1: fused QKV projection (B folded into the matmul M dimension).
# --------------------------------------------------------------------------
def _qkv_proj_kernel(x_ref, w_ref, b_ref, q_ref, k_ref, v_ref, *, dkp, dp):
    # x_ref: (TM, D); w_ref: (D, NF); b_ref: (1, NF).  One MXU matmul.
    qkv = jnp.dot(x_ref[...], w_ref[...],
                  preferred_element_type=jnp.float32) + b_ref[...]
    # Lane-aligned slices; store back in the input dtype (keeps bf16 fast path
    # for the downstream attention matmuls).  Stores are full-width / unmasked.
    q_ref[...] = qkv[:, 0:dkp].astype(q_ref.dtype)
    k_ref[...] = qkv[:, dkp:2 * dkp].astype(k_ref.dtype)
    v_ref[...] = qkv[:, 2 * dkp:2 * dkp + dp].astype(v_ref.dtype)


# --------------------------------------------------------------------------
# Kernel 2: flash attention with online softmax over KV tiles.
# --------------------------------------------------------------------------
def _flash_attention_kernel(q_ref, k_ref, v_ref, o_ref, m_sc, l_sc, acc_sc):
    ki = pl.program_id(2)

    @pl.when(ki == 0)
    def _():
        m_sc[...] = jnp.full(m_sc.shape, -jnp.inf, dtype=m_sc.dtype)
        l_sc[...] = jnp.zeros(l_sc.shape, dtype=l_sc.dtype)
        acc_sc[...] = jnp.zeros(acc_sc.shape, dtype=acc_sc.dtype)

    q = q_ref[0]                                   # (TQ, DKP), input dtype
    k = k_ref[0]                                   # (TKV, DKP)
    v = v_ref[0]                                   # (TKV, DP)

    # Scores (1/sqrt(d_key) already folded into w_q/b_q): contract last dims
    # (transposed-B matmul, no explicit k.T), f32 accumulation on the MXU.
    s = lax.dot_general(q, k, (((1,), (1,)), ((), ())),
                        preferred_element_type=jnp.float32)          # (TQ, TKV)

    m_prev = m_sc[...]
    m_new = jnp.maximum(m_prev, jnp.max(s, axis=-1, keepdims=True))  # (TQ, 1)
    alpha = jnp.exp(m_prev - m_new)                                  # (TQ, 1)
    p = jnp.exp(s - m_new)                                           # (TQ, TKV) f32

    l_sc[...] = alpha * l_sc[...] + jnp.sum(p, axis=-1, keepdims=True)
    acc_sc[...] = alpha * acc_sc[...] + jnp.dot(
        p.astype(v.dtype), v, preferred_element_type=jnp.float32)
    m_sc[...] = m_new

    @pl.when(ki == pl.num_programs(2) - 1)
    def _():
        # Deferred, EXACT normalization: one (TQ,1) reciprocal + (TQ,DP) mul.
        inv = 1.0 / l_sc[...]
        o_ref[0] = (acc_sc[...] * inv).astype(o_ref.dtype)


# --------------------------------------------------------------------------
# Wrapper / parameter preparation.
# --------------------------------------------------------------------------
def prepare_self_attention_params(wq, bq, wk, bk, wv, bv):
    """One-time weight prep (call at init, NOT per forward):
    fold the softmax scale into w_q/b_q, zero-pad each projection's output
    dim to a 128-lane multiple, and concatenate into one fused weight/bias."""
    D, DK = wq.shape
    DKP = _round_up(DK, LANE)
    DP = _round_up(D, LANE)
    scale = 1.0 / math.sqrt(DK)          # PyTorch uses the TRUE d_key

    def pad_cols(a, n):
        return jnp.pad(a, ((0, 0), (0, n - a.shape[1])))

    bq2, bk2, bv2 = bq.reshape(1, -1), bk.reshape(1, -1), bv.reshape(1, -1)
    w_fused = jnp.concatenate(
        [pad_cols(wq * scale, DKP), pad_cols(wk, DKP), pad_cols(wv, DP)], axis=1)
    b_fused = jnp.concatenate(
        [pad_cols(bq2 * scale, DKP), pad_cols(bk2, DKP), pad_cols(bv2, DP)],
        axis=1)
    return dict(w_fused=w_fused, b_fused=b_fused,
                d_model=D, d_key=DK, dkp=DKP, dp=DP)


def self_attention(x, params, *, tq=256, tkv=512,
                   vmem_limit_bytes=48 * 1024 * 1024):
    """x: (B, S, d_model).  tq/tkv defaults sized for v7x's 64 MiB VMEM;
    on v6e/v5e (128 MiB) larger tiles / a higher vmem limit can be used."""
    B, S, D = x.shape
    assert D == params["d_model"]
    w_fused, b_fused = params["w_fused"], params["b_fused"]
    DKP, DP = params["dkp"], params["dp"]
    NF = w_fused.shape[1]

    # ---- Kernel 1: fused QKV projection over (B*S, D) ----
    BS = B * S
    TM = _pick_tile(BS, 512)
    x2 = x.reshape(BS, D)

    q2, k2, v2 = pl.pallas_call(
        functools.partial(_qkv_proj_kernel, dkp=DKP, dp=DP),
        out_shape=(
            jax.ShapeDtypeStruct((BS, DKP), x.dtype),
            jax.ShapeDtypeStruct((BS, DKP), x.dtype),
            jax.ShapeDtypeStruct((BS, DP), x.dtype),
        ),
        grid_spec=pltpu.PrefetchScalarGridSpec(
            num_scalar_prefetch=0,
            grid=(BS // TM,),
            in_specs=[
                pl.BlockSpec((TM, D), lambda i: (i, 0)),     # x tile
                pl.BlockSpec((D, NF), lambda i: (0, 0)),     # fused W (resident)
                pl.BlockSpec((1, NF), lambda i: (0, 0)),     # fused bias
            ],
            out_specs=(
                pl.BlockSpec((TM, DKP), lambda i: (i, 0)),
                pl.BlockSpec((TM, DKP), lambda i: (i, 0)),
                pl.BlockSpec((TM, DP), lambda i: (i, 0)),
            ),
        ),
        compiler_params=pltpu.CompilerParams(
            dimension_semantics=("parallel",),
            vmem_limit_bytes=vmem_limit_bytes,
        ),
    )(x2, w_fused, b_fused)

    q = q2.reshape(B, S, DKP)
    k = k2.reshape(B, S, DKP)
    v = v2.reshape(B, S, DP)

    # ---- Kernel 2: flash attention, KV axis last + "arbitrary" ----
    TQ = _pick_tile(S, tq)
    TKV = _pick_tile(S, tkv)
    nq, nkv = S // TQ, S // TKV

    out = pl.pallas_call(
        _flash_attention_kernel,
        out_shape=jax.ShapeDtypeStruct((B, S, DP), x.dtype),
        grid_spec=pltpu.PrefetchScalarGridSpec(
            num_scalar_prefetch=0,
            grid=(B, nq, nkv),
            in_specs=[
                pl.BlockSpec((1, TQ, DKP), lambda b, qi, ki: (b, qi, 0)),
                pl.BlockSpec((1, TKV, DKP), lambda b, qi, ki: (b, ki, 0)),
                pl.BlockSpec((1, TKV, DP), lambda b, qi, ki: (b, ki, 0)),
            ],
            out_specs=pl.BlockSpec((1, TQ, DP), lambda b, qi, ki: (b, qi, 0)),
            scratch_shapes=[
                pltpu.VMEM((TQ, 1), jnp.float32),    # running max
                pltpu.VMEM((TQ, 1), jnp.float32),    # running denom
                pltpu.VMEM((TQ, DP), jnp.float32),   # output accumulator
            ],
        ),
        compiler_params=pltpu.CompilerParams(
            dimension_semantics=("parallel", "parallel", "arbitrary"),
            vmem_limit_bytes=vmem_limit_bytes,
        ),
    )(q, k, v)

    # Drop the zero padding on the value/output dim (no-op when d_model is
    # already a 128 multiple; otherwise one extra HBM pass -- keep the padded
    # layout downstream if that matters).
    return out[..., :D] if DP != D else out


def self_attention_ref(x, wq, bq, wk, bk, wv, bv):
    q = x @ wq + bq
    k = x @ wk + bk
    v = x @ wv + bv
    a = (q @ jnp.swapaxes(k, -2, -1)) / math.sqrt(k.shape[-1])
    a = jax.nn.softmax(a, axis=-1)
    return a @ v


if __name__ == "__main__":
    B, S, D_MODEL, D_KEY = 2, 8, 32, 16

    key = jax.random.PRNGKey(0)
    kx, kwq, kbq, kwk, kbk, kwv, kbv = jax.random.split(key, 7)

    x = jax.random.normal(kx, (B, S, D_MODEL), dtype=jnp.float32)

    # Deterministic parameter init (uniform like nn.Linear's default range).
    lim = 1.0 / math.sqrt(D_MODEL)
    wq = jax.random.uniform(kwq, (D_MODEL, D_KEY), jnp.float32, -lim, lim)
    bq = jax.random.uniform(kbq, (D_KEY,), jnp.float32, -lim, lim)
    wk = jax.random.uniform(kwk, (D_MODEL, D_KEY), jnp.float32, -lim, lim)
    bk = jax.random.uniform(kbk, (D_KEY,), jnp.float32, -lim, lim)
    wv = jax.random.uniform(kwv, (D_MODEL, D_MODEL), jnp.float32, -lim, lim)
    bv = jax.random.uniform(kbv, (D_MODEL,), jnp.float32, -lim, lim)

    params = prepare_self_attention_params(wq, bq, wk, bk, wv, bv)

    z = self_attention(x, params)
    z = jax.block_until_ready(z)

    z_ref = self_attention_ref(x, wq, bq, wk, bk, wv, bv)
    assert z.shape == (B, S, D_MODEL)
    assert jnp.allclose(z, z_ref, atol=1e-4, rtol=1e-4), "mismatch vs reference"

    print("KERNEL_OK")
</pallas_src>

<mosaic_0001>
module attributes {stable_mosaic.version = 11 : i64} {
  func.func @_qkv_proj_kernel(%arg0: i32, %arg1: memref<16x32xf32, #tpu.memory_space<vmem>>, %arg2: memref<32x384xf32, #tpu.memory_space<vmem>>, %arg3: memref<1x384xf32, #tpu.memory_space<vmem>>, %arg4: memref<16x128xf32, #tpu.memory_space<vmem>>, %arg5: memref<16x128xf32, #tpu.memory_space<vmem>>, %arg6: memref<16x128xf32, #tpu.memory_space<vmem>>) attributes {dimension_semantics = [#tpu.dimension_semantics<parallel>], iteration_bounds = array<i64: 1>, scalar_prefetch = 0 : i64, scratch_operands = 0 : i64, tpu.core_type = #tpu.core_type<tc>, window_params = [{transform_indices = @transform_0, window_bounds = array<i64: 16, 32>}, {pipeline_mode = #tpu.pipeline_mode<synchronous>, transform_indices = @transform_1, window_bounds = array<i64: 32, 384>}, {pipeline_mode = #tpu.pipeline_mode<synchronous>, transform_indices = @transform_2, window_bounds = array<i64: 1, 384>}, {transform_indices = @transform_3, window_bounds = array<i64: 16, 128>}, {transform_indices = @transform_4, window_bounds = array<i64: 16, 128>}, {transform_indices = @transform_5, window_bounds = array<i64: 16, 128>}]} {
    %c0 = arith.constant 0 : index
    %c0_0 = arith.constant 0 : index
    %0 = vector.load %arg1[%c0, %c0_0] : memref<16x32xf32, #tpu.memory_space<vmem>>, vector<16x32xf32>
    %c0_1 = arith.constant 0 : index
    %c0_2 = arith.constant 0 : index
    %1 = vector.load %arg2[%c0_1, %c0_2] : memref<32x384xf32, #tpu.memory_space<vmem>>, vector<32x384xf32>
    %cst = arith.constant dense<0.000000e+00> : vector<16x384xf32>
    %2 = tpu.matmul %0, %1, %cst {dimension_numbers = #tpu.dot_dimension_numbers<[1], [0], [0], [1], [0, 0, 1, 1], [], []>} : vector<16x32xf32>, vector<32x384xf32>, vector<16x384xf32> -> vector<16x384xf32>
    %c0_3 = arith.constant 0 : index
    %c0_4 = arith.constant 0 : index
    %3 = vector.load %arg3[%c0_3, %c0_4] : memref<1x384xf32, #tpu.memory_space<vmem>>, vector<1x384xf32>
    %4 = vector.broadcast %3 : vector<1x384xf32> to vector<16x384xf32>
    %5 = arith.addf %2, %4 : vector<16x384xf32>
    %6 = vector.extract_strided_slice %5 {offsets = [0, 0], sizes = [16, 128], strides = [1, 1]} : vector<16x384xf32> to vector<16x128xf32>
    %c0_5 = arith.constant 0 : index
    %c0_6 = arith.constant 0 : index
    %7 = vector.load %arg4[%c0_5, %c0_6] : memref<16x128xf32, #tpu.memory_space<vmem>>, vector<16x128xf32>
    tpu.vector_store %arg4[%c0_5, %c0_6], %6 {strides = array<i32>} : memref<16x128xf32, #tpu.memory_space<vmem>>, vector<16x128xf32>,
    %8 = vector.extract_strided_slice %5 {offsets = [0, 128], sizes = [16, 128], strides = [1, 1]} : vector<16x384xf32> to vector<16x128xf32>
    %c0_7 = arith.constant 0 : index
    %c0_8 = arith.constant 0 : index
    %9 = vector.load %arg5[%c0_7, %c0_8] : memref<16x128xf32, #tpu.memory_space<vmem>>, vector<16x128xf32>
    tpu.vector_store %arg5[%c0_7, %c0_8], %8 {strides = array<i32>} : memref<16x128xf32, #tpu.memory_space<vmem>>, vector<16x128xf32>,
    %10 = vector.extract_strided_slice %5 {offsets = [0, 256], sizes = [16, 128], strides = [1, 1]} : vector<16x384xf32> to vector<16x128xf32>
    %c0_9 = arith.constant 0 : index
    %c0_10 = arith.constant 0 : index
    %11 = vector.load %arg6[%c0_9, %c0_10] : memref<16x128xf32, #tpu.memory_space<vmem>>, vector<16x128xf32>
    tpu.vector_store %arg6[%c0_9, %c0_10], %10 {strides = array<i32>} : memref<16x128xf32, #tpu.memory_space<vmem>>, vector<16x128xf32>,
    return
  }
  func.func @transform_0(%arg0: i32) -> (i32, i32) {
    %c0_i32 = arith.constant 0 : i32
    %c0_i32_0 = arith.constant 0 : i32
    return %arg0, %c0_i32 : i32, i32
  }
  func.func @transform_1(%arg0: i32) -> (i32, i32) {
    %c0_i32 = arith.constant 0 : i32
    %c0_i32_0 = arith.constant 0 : i32
    %c0_i32_1 = arith.constant 0 : i32
    return %c0_i32, %c0_i32_0 : i32, i32
  }
  func.func @transform_2(%arg0: i32) -> (i32, i32) {
    %c0_i32 = arith.constant 0 : i32
    %c0_i32_0 = arith.constant 0 : i32
    %c0_i32_1 = arith.constant 0 : i32
    return %c0_i32, %c0_i32_0 : i32, i32
  }
  func.func @transform_3(%arg0: i32) -> (i32, i32) {
    %c0_i32 = arith.constant 0 : i32
    %c0_i32_0 = arith.constant 0 : i32
    return %arg0, %c0_i32 : i32, i32
  }
  func.func @transform_4(%arg0: i32) -> (i32, i32) {
    %c0_i32 = arith.constant 0 : i32
    %c0_i32_0 = arith.constant 0 : i32
    return %arg0, %c0_i32 : i32, i32
  }
  func.func @transform_5(%arg0: i32) -> (i32, i32) {
    %c0_i32 = arith.constant 0 : i32
    %c0_i32_0 = arith.constant 0 : i32
    return %arg0, %c0_i32 : i32, i32
  }
}

</mosaic_0001>

<bundles_post_ra>
// kernel: tpu_custom_call.1
= control target key start
LH: loop header
LB: loop body
LE: loop exit
PB: predicated region body
PF: predicated region fallthrough
CT: control target
= control target key end

     0   :  { %11 = vsyncpa [#allocation3], 0  ;;  %s501_s0 = inlined_call_operand.hbm [shape: f32[16,32], index: 0, kind: input, shape index: {}]   ;;  %s502_s1 = inlined_call_operand.hbm [shape: f32[32,384], index: 1, kind: input, shape index: {}]   ;;  %s503_s2 = inlined_call_operand.vmem [shape: f32[1,384], index: 2, kind: input, shape index: {}]   ;;  %s504_s3 = inlined_call_operand.hbm [shape: f32[16,128], index: 3, kind: output, shape index: {0}]   ;;  %s505_s4 = inlined_call_operand.hbm [shape: f32[16,128], index: 4, kind: output, shape index: {1}]   ;;  %s506_s5 = inlined_call_operand.hbm [shape: f32[16,128], index: 5, kind: output, shape index: {2}]  }
   0x1   :  { %12 = vsyncpa [#allocation6], 0 }
   0x2   :  { %13 = vsyncpa [#allocation4], 0 }
   0x3   :  { %14 = vsyncpa [#allocation9], 0  ;;  %s431_s18 = smov [#allocation2]  }
   0x4   :  { %s20_s19 = sshll.u32 %s431_s18, 4  ;;  %s21_s19 = int_to_ptr.vmem [resolvable:$true] %s20_s19 }
   0x5   :  { %s331_s20 = scalar_lea.vmem %s21_s19, 256  ;;  %p336_p1 = scmp.lt.s32.totalorder %s21_s19, %s21_s19 }
   0x6   :  { %p332_p0 = scmp.ne.s32.totalorder %s21_s19, %s331_s20  ;;  %p337_p2 = scmp.lt.s32.totalorder %s331_s20, %s331_s20 }
   0x8   :  { %p338_p3 = por %p337_p2, %p336_p1 }
   0xa   :  { %p339_p4 = pnand %p338_p3, %p332_p0 }
   0xc   :  { %342 = shalt.err (!%p339_p4)
}
   0xd   :  { %s432_s21 = smov 128   ;;  %s433_s22 = smov 8  }
   0xe   :  { %26 = dma.hbm_to_vmem [thread:$0]  %s501_s0, 256, %s21_s19, [#allocation3], %s432_s21, %s432_s21, %s433_s22  }
   0xf   :  { %s434_s25 = smov [#allocation5]  }
  0x10   :  { %s32_s26 = sshll.u32 %s434_s25, 4  ;;  %s33_s26 = int_to_ptr.vmem [resolvable:$true] %s32_s26 }
  0x11   :  { %s351_s27 = scalar_lea.vmem %s33_s26, 1536  ;;  %p356_p6 = scmp.lt.s32.totalorder %s33_s26, %s33_s26 }
  0x12   :  { %p352_p5 = scmp.ne.s32.totalorder %s33_s26, %s351_s27  ;;  %p357_p7 = scmp.lt.s32.totalorder %s351_s27, %s351_s27 }
  0x14   :  { %p358_p8 = por %p357_p7, %p356_p6 }
  0x16   :  { %p359_p9 = pnand %p358_p8, %p352_p5 }
  0x18   :  { %362 = shalt.err (!%p359_p9)
}
  0x19   :  { %s435_s28 = smov 384   ;;  %s436_s29 = smov 24  }
  0x1a   :  { %38 = dma.hbm_to_vmem [thread:$0]  %s502_s1, 1536, %s33_s26, [#allocation6], %s435_s28, %s435_s28, %s436_s29  }
  0x1b   :  { %423 = dma.done.wait [#allocation3], 256  }
  0x1c   :  { %424 = vsyncadd [#allocation3], 4294967040 }
  0x1d   :  { %425 = dma.done.wait [#allocation6], 1536  }
  0x1e   :  { %426 = vsyncadd [#allocation6], 4294965760  ;;  %v437_v0 = vmov 0.0   ;;  %v59_v1 = vld [vmem:[#allocation5 + $0x50] sm:$0xff]  ;;  %v58_v2 = vld [vmem:[#allocation5 + $0x48] sm:$0xff]  ;;  %vm78_vm0 = vcmask 261120   ;;  %v63_v15 = vlaneseq }
  0x1f   :  { %149 = vmatprep.mubr.f32.mxu0 %v437_v0  ;;  %v56_v3 = vld [vmem:[#allocation5 + $0x38] sm:$0xff]  ;;  %109 = vmatprep.subr.mxu0 %v59_v1  ;;  %v55_v4 = vld [vmem:[#allocation5 + $0x30] sm:$0xff]  ;;  %v53_v6 = vld [vmem:[#allocation5 + $0x20] sm:$0xff]  ;;  %s438_s7 = smov [#allocation7]   ;;  %s439_s9 = smov [#allocation8]  }
  0x20   :  { %v60_v5 = vld [vmem:[#allocation5 + $0x58] sm:$0xff]  ;;  %110 = vmatpush1.msra.mxu0 %v58_v2  ;;  %v57_v7 = vld [vmem:[#allocation5 + $0x40] sm:$0xff]  ;;  %v54_v9 = vld [vmem:[#allocation5 + $0x28] sm:$0xff]  ;;  %v64_v16 = vshrl.u32 %v63_v15, 7  ;;  %s248_s8 = sshll.u32 %s438_s7, 4  ;;  %s260_s10 = sshll.u32 %s439_s9, 4  ;;  %s249_s8 = int_to_ptr.vmem [resolvable:$true] %s248_s8  ;;  %s261_s10 = int_to_ptr.vmem [resolvable:$true] %s260_s10 }
  0x21   :  { %302 = vmatprep.subr.mxu1 %v60_v5  ;;  %111 = vmatprep.subr.mxu0 %v56_v3  ;;  %v52_v8 = vld [vmem:[#allocation5 + $0x18] sm:$0xff]  ;;  %v50_v10 = vld [vmem:[#allocation5 + $0x8] sm:$0xff]  ;;  %v49_v11 = vld [vmem:[#allocation5] sm:$0xff]  ;;  %s440_s11 = smov [#allocation10]   ;;  %s363_s12 = scalar_lea.vmem %s249_s8, 256 }
  0x22   :  { %303 = vmatpush3.msra.mxu1 %v60_v5  ;;  %112 = vmatpush1.msra.mxu0 %v55_v4  ;;  %v51_v12 = vld [vmem:[#allocation5 + $0x10] sm:$0xff]  ;;  %v48_v14 = vld [vmem:[#allocation2 + $0x8] sm:$0xff]  ;;  %v65_v17 = vsub.s32 0, %v64_v16  ;;  %v69_v19 = vsub.s32 1, %v64_v16  ;;  %v73_v20 = vsub.s32 2, %v64_v16  ;;  %p364_p10 = scmp.ne.s32.totalorder %s249_s8, %s363_s12  ;;  %p368_p11 = scmp.lt.s32.totalorder %s249_s8, %s249_s8 }
  0x23   :  { %304 = vmatprep.subr.mxu1 %v57_v7  ;;  %113 = vmatprep.subr.mxu0 %v53_v6  ;;  %v47_v13 = vld [vmem:[#allocation2] sm:$0xff]  ;;  %p369_p12 = scmp.lt.s32.totalorder %s363_s12, %s363_s12 }
  0x24   :  { %305 = vmatpush3.msra.mxu1 %v57_v7  ;;  %114 = vmatpush1.msra.mxu0 %v52_v8  ;;  %v61_v18 = vld [vmem:[%s503_s2] sm:$0x7]  ;;  %s272_s2 = sshll.u32 %s440_s11, 4  ;;  %s273_s2 = int_to_ptr.vmem [resolvable:$true] %s272_s2 }
  0x25   :  { %306 = vmatprep.subr.mxu1 %v54_v9  ;;  %115 = vmatprep.subr.mxu0 %v50_v10  ;;  %v66_v21 = vrot.slane %v61_v18, %v65_v17  ;;  %v70_v22 = vrot.slane %v61_v18, %v69_v19  ;;  %v74_v23 = vrot.slane %v61_v18, %v73_v20  ;;  %p370_p13 = por %p369_p12, %p368_p11 }
  0x26   :  { %307 = vmatpush3.msra.mxu1 %v54_v9  ;;  %116 = vmatpush1.msra.mxu0 %v49_v11 }
  0x27   :  { %308 = vmatprep.subr.mxu1 %v51_v12  ;;  %292 = vmatmul.mubr.msk.f32.vlgmr.msra.gmra.mxu0 %vm78_vm0, %v47_v13  ;;  %p371_p0 = pnand %p370_p13, %p364_p10 }
  0x28   :  { %309 = vmatpush3.msra.mxu1 %v51_v12  ;;  %310 = vmatprep.mubr.msk.f32.mxu1 %vm78_vm0, %v47_v13 }
  0x29   :  { %155 = vmatprep.mubr.f32.mxu0 %v437_v0  ;;  %311 = vmatmul.mubr.msk.f32.vlgmr.msra.gmra.mxu1 %vm78_vm0, %v48_v14 }
  0x2b   :  { %293 = vmatmul.mubr.msk.f32.gmra.mxu0 %vm78_vm0, %v48_v14 }
  0xe7   :  { %v151_v24 = vpop.f32.mrf.mxu0 }
  0xe8   :  { %v152_v25 = vadd.f32 %v151_v24, %v66_v21 }
  0xe9   :  { %v153_v26 = vpop.f32.mrf.mxu0  ;;  %v312_v27 = vpop.f32.mrf.mxu1 }
  0xea   :  { %237 = vst [vmem:[#allocation7] sm:$0xff] %v152_v25  ;;  %v154_v28 = vadd.f32 %v153_v26, %v70_v22  ;;  %v234_v29 = vadd.f32 %v312_v27, %v74_v23 }
  0xeb   :  { %v157_v30 = vpop.f32.mrf.mxu0  ;;  %v228_v31 = vpop.f32.mrf.mxu1 }
  0xec   :  { %239 = vst [vmem:[#allocation8] sm:$0xff] %v154_v28  ;;  %242 = vst [vmem:[#allocation10 + $0x8] sm:$0xff] %v234_v29  ;;  %v158_v32 = vadd.f32 %v157_v30, %v66_v21  ;;  %v229_v33 = vadd.f32 %v228_v31, %v74_v23 }
  0xed   :  { %v159_v34 = vpop.f32.mrf.mxu0 }
  0xee   :  { %238 = vst [vmem:[#allocation7 + $0x8] sm:$0xff] %v158_v32  ;;  %241 = vst [vmem:[#allocation10] sm:$0xff] %v229_v33  ;;  %v160_v35 = vadd.f32 %v159_v34, %v70_v22 }
  0xef   :  { %374 = shalt.err (!%p371_p0)
}
  0xf0   :  { %254 = dma.vmem_to_hbm [thread:$0]  %s249_s8, 256, %s504_s3, [#allocation4], %s432_s21, %s432_s21, %s433_s22   ;;  %240 = vst [vmem:[#allocation8 + $0x8] sm:$0xff] %v160_v35 }
  0xf1   :  { %s383_s15 = scalar_lea.vmem %s261_s10, 256  ;;  %p388_p2 = scmp.lt.s32.totalorder %s261_s10, %s261_s10 }
  0xf2   :  { %p384_p1 = scmp.ne.s32.totalorder %s261_s10, %s383_s15  ;;  %p389_p3 = scmp.lt.s32.totalorder %s383_s15, %s383_s15 }
  0xf4   :  { %p390_p4 = por %p389_p3, %p388_p2 }
  0xf6   :  { %p391_p5 = pnand %p390_p4, %p384_p1 }
  0xf8   :  { %394 = shalt.err (!%p391_p5)
}
  0xf9   :  { %266 = dma.vmem_to_hbm [thread:$0]  %s261_s10, 256, %s505_s4, [#allocation9], %s432_s21, %s432_s21, %s433_s22  }
  0xfa   :  { %s403_s18 = scalar_lea.vmem %s273_s2, 256  ;;  %p408_p7 = scmp.lt.s32.totalorder %s273_s2, %s273_s2 }
  0xfb   :  { %p404_p6 = scmp.ne.s32.totalorder %s273_s2, %s403_s18  ;;  %p409_p8 = scmp.lt.s32.totalorder %s403_s18, %s403_s18 }
  0xfd   :  { %p410_p9 = por %p409_p8, %p408_p7 }
  0xff   :  { %p411_p10 = pnand %p410_p9, %p404_p6 }
 0x101   :  { %414 = shalt.err (!%p411_p10)
}
 0x102   :  { %278 = dma.vmem_to_hbm [thread:$0]  %s273_s2, 256, %s506_s5, [#allocation9], %s432_s21, %s432_s21, %s433_s22  }
 0x103   :  { %427 = dma.done.wait [#allocation4], 256  }
 0x104   :  { %428 = vsyncadd [#allocation4], 4294967040 }
 0x105   :  { %429 = dma.done.wait [#allocation9], 512  }
 0x106   :  { %430 = vsyncadd [#allocation9], 4294966784 }
 0x107   :  { %288 = vsyncpa [#allocation3], 1 }
 0x108   :  { %289 = vsyncpa [#allocation6], 1 }
 0x109   :  { %290 = vsyncpa [#allocation4], 1 }
 0x10a   :  { %291 = vsyncpa [#allocation9], 1 }

</bundles_post_ra>
